<compile_context>
chip_gen: v7x
topology: tpu7x:2x2x1
jax: 0.10.0
libtpu: 0.0.40
codegen_flags: <defaults>
</compile_context>

<pallas_src>
import math
import functools

import jax
import jax.numpy as jnp
from jax.experimental import pallas as pl
from jax.experimental.pallas import tpu as pltpu

_HALF_LOG_2PI = 0.5 * math.log(2.0 * math.pi)


# ---------------------------------------------------------------------------
# Fused digamma / lgamma built from elementary ops (Mosaic has no lowering for
# the special-function primitives): shift the argument up by 8 via the
# recurrences, then evaluate the asymptotic (Stirling) series at y = x + 8.
#
# EUP-cutting tricks (the kernel is EUP-slot bound):
#   * psi shift sum_{k<8} 1/(x+k): one exact divide per group of four via
#       1/a + 1/b + 1/c + 1/d = ((a+b)*cd + (c+d)*ab) / (ab*cd)
#     -> 2 EUP divides total (was 4); the extra multiplies land on the VPU.
#   * the quad products double as the lgamma-shift log arguments and are
#     consumed into lg_shift immediately (small live set -> less spill).
#   * series 1/y: one EUP vrcp (pl.reciprocal approx) + one VPU Newton step.
# Valid for x > 0 with x**4 finite in f32 (x < ~4e9); f32 accurate.
# ---------------------------------------------------------------------------
def _digamma_lgamma(x, *, need_lgamma=True):
    # ---- group 0: x .. x+3 --------------------------------------------------
    a0, a1, a2, a3 = x, x + 1.0, x + 2.0, x + 3.0
    p01 = a0 * a1
    p23 = a2 * a3
    g0 = p01 * p23
    psi_shift = ((a0 + a1) * p23 + (a2 + a3) * p01) / g0          # EUP divide 1
    lg_shift = jnp.log(g0) if need_lgamma else None               # consume g0 now

    # ---- group 1: x+4 .. x+7 ------------------------------------------------
    a4, a5, a6, a7 = x + 4.0, x + 5.0, x + 6.0, x + 7.0
    p45 = a4 * a5
    p67 = a6 * a7
    g1 = p45 * p67
    psi_shift = psi_shift + ((a4 + a5) * p67 + (a6 + a7) * p45) / g1  # EUP div 2
    if need_lgamma:
        lg_shift = lg_shift + jnp.log(g1)                         # consume g1 now

    # ---- Stirling series at y = x + 8 ---------------------------------------
    y = x + 8.0
    log_y = jnp.log(y)
    r = pl.reciprocal(y, approx=True)                             # single EUP vrcp
    inv = r * (2.0 - y * r)                                       # Newton step (VPU)
    inv2 = inv * inv

    digamma = (log_y - 0.5 * inv
               - inv2 * (1.0 / 12.0 - inv2 * (1.0 / 120.0 - inv2 * (1.0 / 252.0)))
               - psi_shift)
    if not need_lgamma:
        return digamma

    lgamma = ((y - 0.5) * log_y - y + _HALF_LOG_2PI
              + inv * (1.0 / 12.0 - inv2 * (1.0 / 360.0 - inv2 * (1.0 / 1260.0)))
              - lg_shift)
    return digamma, lgamma


# ---------------------------------------------------------------------------
# Kernel: one native-layout batch block (tb, C)  ->  per-sample loss (1, tb)
# ---------------------------------------------------------------------------
def edl_ce_kernel(logits_ref, labels_ref, loss_ref, pad_ref, *,
                  num_classes, batch, rho, mode):
    c = num_classes
    tb = logits_ref.shape[0]

    # ---- in-kernel relayout: batch-on-sublanes -> batch-on-lanes ------------
    # The block arrives in its native (tb, C) row-major layout (no wrapper-side
    # pad+transpose HBM round-trip).  Stage it into a lane-padded VMEM scratch
    # (masked store to lanes [0:C]) and do one fully (8,128)-aligned transpose;
    # the padding rows of the transposed value are simply never read.  The XLU
    # is otherwise idle (EUP-bound kernel), so the relayout hides under the
    # transcendentals.
    pad_ref[:, 0:c] = logits_ref[...].astype(jnp.float32)
    logits = pad_ref[...].T[0:c, :]                     # (C, tb)
    labels = labels_ref[...]                            # (1, tb) int32

    if mode == "exp":
        alphas = jnp.exp(logits)
    elif mode == "relu":
        alphas = jnp.maximum(logits, 0.0) + 1.0
    else:
        raise ValueError(mode)

    labels_f = labels.astype(jnp.float32)               # (1, tb)

    # ---- evidential cross-entropy term ---------------------------------------
    # mean_c labels*(dg_sum - dg_c) == labels*(dg_sum - mean_c dg_c): the class
    # reduction is streamed, no (C, tb) "ce" temporary stays live.
    alpha_sum = jnp.sum(alphas, axis=0, keepdims=True)             # (1, tb)
    dg_alpha_sum = _digamma_lgamma(alpha_sum, need_lgamma=False)
    sum_dg_alpha = jnp.sum(_digamma_lgamma(alphas, need_lgamma=False),
                           axis=0, keepdims=True)                  # (1, tb)
    ce_mean = labels_f * (dg_alpha_sum - sum_dg_alpha * (1.0 / c))

    # ---- KL( Dirichlet(alphas_tilde) || Dirichlet(1) ) ------------------------
    # alphas_hat[b, labels[b]] = 1 ; alphas_tilde = alphas_hat + 1e-6
    class_iota = jax.lax.broadcasted_iota(jnp.int32, (c, tb), 0)
    alphas_tilde = jnp.where(class_iota == labels, 1.0, alphas) + 1e-6
    a0 = jnp.sum(alphas_tilde, axis=0, keepdims=True)              # (1, tb)
    dg_at, lg_at = _digamma_lgamma(alphas_tilde)                   # (C, tb) x2
    dg_a0, lg_a0 = _digamma_lgamma(a0)                             # (1, tb) x2

    # sum_c (at-1)*(dg_at - dg_a0) == sum_c (at-1)*dg_at - dg_a0*(a0 - C):
    # avoids broadcasting dg_a0 to (C, tb); reductions streamed to (1, tb).
    sum_lg_at = jnp.sum(lg_at, axis=0, keepdims=True)
    sum_term = jnp.sum((alphas_tilde - 1.0) * dg_at, axis=0, keepdims=True)
    kl = (lg_a0 - sum_lg_at - math.lgamma(float(c))
          + sum_term - dg_a0 * (a0 - float(c)))

    loss = ce_mean + rho * kl                                      # (1, tb)

    # Mask lanes beyond the real batch (tiny-batch zero padding and the stale
    # data read into a ragged final block).  Lane-dense (1, tb) store.
    gidx = pl.program_id(0) * tb + jax.lax.broadcasted_iota(jnp.int32, (1, tb), 1)
    loss_ref[...] = jnp.where(gidx < batch, loss, 0.0)


# ---------------------------------------------------------------------------
# Batch-tile selection: as large as a conservative VMEM budget allows
# (amortizes the ~0.35us/step grid overhead), 128-lane aligned, and small
# enough to keep >= 2 grid steps when the batch allows it (v7x megacore).
# ---------------------------------------------------------------------------
def _pick_tb(B, C):
    lane_c = 128 * pl.cdiv(C, 128)
    # rough per-batch-row VMEM bytes: double-buffered (tb, C) input block,
    # lane-padded relayout scratch + its transposed temporary, and ~12 live
    # (C, tb) f32 intermediates inside the kernel.
    bytes_per_row = 4 * (2 * C + 12 * C) + 8 * lane_c + 16
    budget = 10 << 20                 # stays under v5e's 16 MiB scoped default
    tb = min(4096, budget // bytes_per_row)
    tb = max(128, (tb // 128) * 128)
    # TODO(synk): for very large C, a second "arbitrary" class-chunk grid axis
    # with a VMEM accumulator would keep tb large; here tb simply shrinks.

    b_floor = 128 * (B // 128)
    if b_floor == 0:                  # tiny batch: one padded 128-lane tile
        return 128
    tb = min(tb, b_floor)
    # keep >= 2 grid steps when possible: a single step leaves one v7x
    # TensorCore idle under dimension_semantics=("parallel",).
    if pl.cdiv(B, tb) < 2 and b_floor >= 256:
        tb = max(128, ((B // 2) // 128) * 128)
    return tb


# ---------------------------------------------------------------------------
# Wrapper
# ---------------------------------------------------------------------------
def edl_ce_loss(logits, labels, *, rho=1.0, mode="exp", tb=None):
    B, C = logits.shape
    if tb is None:
        tb = _pick_tb(B, C)
    assert tb % 128 == 0

    labels_row = labels.astype(jnp.int32).reshape(1, B)
    if B < tb:
        # Only tiny batches pay a (tiny) contiguous zero pad up to one tile;
        # everything else is fed unpadded (ragged final blocks are masked
        # inside the kernel, and OOB output lanes are dropped by Pallas).
        logits = jnp.pad(logits, ((0, tb - B), (0, 0)))
        labels_row = jnp.pad(labels_row, ((0, 0), (0, tb - B)))
    b_arr = logits.shape[0]
    lane_c = 128 * pl.cdiv(C, 128)

    kernel = functools.partial(edl_ce_kernel, num_classes=C, batch=B,
                               rho=float(rho), mode=mode)

    per_sample = pl.pallas_call(
        kernel,
        out_shape=jax.ShapeDtypeStruct((1, b_arr), jnp.float32),
        grid=(pl.cdiv(b_arr, tb),),
        in_specs=[pl.BlockSpec((tb, C), lambda i: (i, 0)),     # native layout
                  pl.BlockSpec((1, tb), lambda i: (0, i))],
        out_specs=pl.BlockSpec((1, tb), lambda i: (0, i)),
        scratch_shapes=[pltpu.VMEM((tb, lane_c), jnp.float32)],
        compiler_params=pltpu.CompilerParams(dimension_semantics=("parallel",)),
    )(logits, labels_row)

    # padded / masked lanes are zeroed in-kernel, so a straight sum / B is exact
    return jnp.sum(per_sample) / B


# ---------------------------------------------------------------------------
# Pure-JAX reference (same math, jax.scipy special functions) for validation
# ---------------------------------------------------------------------------
def edl_ce_ref(logits, labels, rho=1.0, mode="exp"):
    from jax.scipy.special import digamma, gammaln
    logits = logits.astype(jnp.float32)
    if mode == "exp":
        alphas = jnp.exp(logits)
    else:
        alphas = jnp.maximum(logits, 0.0) + 1.0
    alpha_sum = alphas.sum(1, keepdims=True)
    lab = labels.reshape(-1, 1)
    loss = lab.astype(jnp.float32) * (digamma(alpha_sum) - digamma(alphas))
    onehot = jax.lax.broadcasted_iota(jnp.int32, alphas.shape, 1) == lab
    at = jnp.where(onehot, 1.0, alphas) + 1e-6
    a0 = at.sum(1, keepdims=True)
    C = alphas.shape[1]
    kl = (gammaln(a0[:, 0]) - gammaln(at).sum(1) - gammaln(jnp.float32(C))
          + ((at - 1.0) * (digamma(at) - digamma(a0))).sum(1))
    return (loss.mean(1) + rho * kl).mean()


if __name__ == "__main__":
    key = jax.random.PRNGKey(0)
    C = 10
    cases = [
        # (batch, rho, mode)
        (16,   1.0, "exp"),    # tiny batch: single padded 128-lane tile
        (16,   0.5, "relu"),   # relu evidence branch
        (600,  1.0, "exp"),    # ragged: tb=512, partial final block, masked
        (4096, 1.0, "exp"),    # large-tile path: tb=2048, 2 parallel grid steps
    ]
    keys = iter(jax.random.split(key, 2 * len(cases)))
    for (B, rho, mode) in cases:
        k_logit, k_label = next(keys), next(keys)
        logits = jax.random.normal(k_logit, (B, C), dtype=jnp.float32)
        labels = jax.random.randint(k_label, (B,), 0, C, dtype=jnp.int32)
        out = jax.block_until_ready(edl_ce_loss(logits, labels, rho=rho, mode=mode))
        ref = edl_ce_ref(logits, labels, rho=rho, mode=mode)
        if not jnp.allclose(out, ref, rtol=1e-4, atol=1e-4):
            raise AssertionError(
                f"B={B} mode={mode}: Pallas result {out} != reference {ref}")
    print("KERNEL_OK")
</pallas_src>

<mosaic_0001>
module attributes {stable_mosaic.version = 11 : i64} {
  func.func @edl_ce_kernel(%arg0: i32, %arg1: memref<128x10xf32, #tpu.memory_space<vmem>>, %arg2: memref<1x128xi32, #tpu.memory_space<vmem>>, %arg3: memref<1x128xf32, #tpu.memory_space<vmem>>, %arg4: memref<128x128xf32, #tpu.memory_space<vmem>>) attributes {dimension_semantics = [#tpu.dimension_semantics<parallel>], iteration_bounds = array<i64: 1>, scalar_prefetch = 0 : i64, scratch_operands = 1 : i64, tpu.core_type = #tpu.core_type<tc>, window_params = [{transform_indices = @transform_0, window_bounds = array<i64: 128, 10>}, {transform_indices = @transform_1, window_bounds = array<i64: 1, 128>}, {transform_indices = @transform_2, window_bounds = array<i64: 1, 128>}]} {
    %c0 = arith.constant 0 : index
    %c0_0 = arith.constant 0 : index
    %0 = vector.load %arg1[%c0, %c0_0] : memref<128x10xf32, #tpu.memory_space<vmem>>, vector<128x10xf32>
    %c0_1 = arith.constant 0 : index
    %c0_2 = arith.constant 0 : index
    %1 = vector.load %arg4[%c0_1, %c0_2] : memref<128x128xf32, #tpu.memory_space<vmem>>, vector<128x10xf32>
    tpu.vector_store %arg4[%c0_1, %c0_2], %0 {strides = array<i32>} : memref<128x128xf32, #tpu.memory_space<vmem>>, vector<128x10xf32>,
    %c0_3 = arith.constant 0 : index
    %c0_4 = arith.constant 0 : index
    %2 = vector.load %arg4[%c0_3, %c0_4] : memref<128x128xf32, #tpu.memory_space<vmem>>, vector<128x128xf32>
    %3 = tpu.transpose %2, [1, 0] : vector<128x128xf32> -> vector<128x128xf32>
    %4 = vector.extract_strided_slice %3 {offsets = [0, 0], sizes = [10, 128], strides = [1, 1]} : vector<128x128xf32> to vector<10x128xf32>
    %c0_5 = arith.constant 0 : index
    %c0_6 = arith.constant 0 : index
    %5 = vector.load %arg2[%c0_5, %c0_6] : memref<1x128xi32, #tpu.memory_space<vmem>>, vector<1x128xi32>
    %6 = math.exp %4 : vector<10x128xf32>
    %7 = arith.sitofp %5 : vector<1x128xi32> to vector<1x128xf32>
    %cst = arith.constant dense<0.000000e+00> : vector<128xf32>
    %8 = vector.multi_reduction <add>, %6, %cst [0] : vector<10x128xf32> to vector<128xf32>
    %9 = vector.shape_cast %8 : vector<128xf32> to vector<1x128xf32>
    %cst_7 = arith.constant 1.000000e+00 : f32
    %10 = vector.broadcast %cst_7 : f32 to vector<1x128xf32>
    %11 = arith.addf %9, %10 : vector<1x128xf32>
    %cst_8 = arith.constant 2.000000e+00 : f32
    %12 = vector.broadcast %cst_8 : f32 to vector<1x128xf32>
    %13 = arith.addf %9, %12 : vector<1x128xf32>
    %cst_9 = arith.constant 3.000000e+00 : f32
    %14 = vector.broadcast %cst_9 : f32 to vector<1x128xf32>
    %15 = arith.addf %9, %14 : vector<1x128xf32>
    %16 = arith.mulf %9, %11 : vector<1x128xf32>
    %17 = arith.mulf %13, %15 : vector<1x128xf32>
    %18 = arith.mulf %16, %17 : vector<1x128xf32>
    %19 = arith.addf %9, %11 : vector<1x128xf32>
    %20 = arith.mulf %19, %17 : vector<1x128xf32>
    %21 = arith.addf %13, %15 : vector<1x128xf32>
    %22 = arith.mulf %21, %16 : vector<1x128xf32>
    %23 = arith.addf %20, %22 : vector<1x128xf32>
    %24 = arith.divf %23, %18 : vector<1x128xf32>
    %cst_10 = arith.constant 4.000000e+00 : f32
    %25 = vector.broadcast %cst_10 : f32 to vector<1x128xf32>
    %26 = arith.addf %9, %25 : vector<1x128xf32>
    %cst_11 = arith.constant 5.000000e+00 : f32
    %27 = vector.broadcast %cst_11 : f32 to vector<1x128xf32>
    %28 = arith.addf %9, %27 : vector<1x128xf32>
    %cst_12 = arith.constant 6.000000e+00 : f32
    %29 = vector.broadcast %cst_12 : f32 to vector<1x128xf32>
    %30 = arith.addf %9, %29 : vector<1x128xf32>
    %cst_13 = arith.constant 7.000000e+00 : f32
    %31 = vector.broadcast %cst_13 : f32 to vector<1x128xf32>
    %32 = arith.addf %9, %31 : vector<1x128xf32>
    %33 = arith.mulf %26, %28 : vector<1x128xf32>
    %34 = arith.mulf %30, %32 : vector<1x128xf32>
    %35 = arith.mulf %33, %34 : vector<1x128xf32>
    %36 = arith.addf %26, %28 : vector<1x128xf32>
    %37 = arith.mulf %36, %34 : vector<1x128xf32>
    %38 = arith.addf %30, %32 : vector<1x128xf32>
    %39 = arith.mulf %38, %33 : vector<1x128xf32>
    %40 = arith.addf %37, %39 : vector<1x128xf32>
    %41 = arith.divf %40, %35 : vector<1x128xf32>
    %42 = arith.addf %24, %41 : vector<1x128xf32>
    %cst_14 = arith.constant 8.000000e+00 : f32
    %43 = vector.broadcast %cst_14 : f32 to vector<1x128xf32>
    %44 = arith.addf %9, %43 : vector<1x128xf32>
    %45 = math.log %44 : vector<1x128xf32>
    %46 = tpu.reciprocal %44 {approx = true} : vector<1x128xf32> -> vector<1x128xf32>
    %47 = arith.mulf %44, %46 : vector<1x128xf32>
    %cst_15 = arith.constant 2.000000e+00 : f32
    %48 = vector.broadcast %cst_15 : f32 to vector<1x128xf32>
    %49 = arith.subf %48, %47 : vector<1x128xf32>
    %50 = arith.mulf %46, %49 : vector<1x128xf32>
    %51 = arith.mulf %50, %50 : vector<1x128xf32>
    %cst_16 = arith.constant 5.000000e-01 : f32
    %52 = vector.broadcast %cst_16 : f32 to vector<1x128xf32>
    %53 = arith.mulf %52, %50 : vector<1x128xf32>
    %54 = arith.subf %45, %53 : vector<1x128xf32>
    %cst_17 = arith.constant 0.0039682542 : f32
    %55 = vector.broadcast %cst_17 : f32 to vector<1x128xf32>
    %56 = arith.mulf %51, %55 : vector<1x128xf32>
    %cst_18 = arith.constant 0.00833333377 : f32
    %57 = vector.broadcast %cst_18 : f32 to vector<1x128xf32>
    %58 = arith.subf %57, %56 : vector<1x128xf32>
    %59 = arith.mulf %51, %58 : vector<1x128xf32>
    %cst_19 = arith.constant 0.0833333358 : f32
    %60 = vector.broadcast %cst_19 : f32 to vector<1x128xf32>
    %61 = arith.subf %60, %59 : vector<1x128xf32>
    %62 = arith.mulf %51, %61 : vector<1x128xf32>
    %63 = arith.subf %54, %62 : vector<1x128xf32>
    %64 = arith.subf %63, %42 : vector<1x128xf32>
    %cst_20 = arith.constant 1.000000e+00 : f32
    %65 = vector.broadcast %cst_20 : f32 to vector<10x128xf32>
    %66 = arith.addf %6, %65 : vector<10x128xf32>
    %cst_21 = arith.constant 2.000000e+00 : f32
    %67 = vector.broadcast %cst_21 : f32 to vector<10x128xf32>
    %68 = arith.addf %6, %67 : vector<10x128xf32>
    %cst_22 = arith.constant 3.000000e+00 : f32
    %69 = vector.broadcast %cst_22 : f32 to vector<10x128xf32>
    %70 = arith.addf %6, %69 : vector<10x128xf32>
    %71 = arith.mulf %6, %66 : vector<10x128xf32>
    %72 = arith.mulf %68, %70 : vector<10x128xf32>
    %73 = arith.mulf %71, %72 : vector<10x128xf32>
    %74 = arith.addf %6, %66 : vector<10x128xf32>
    %75 = arith.mulf %74, %72 : vector<10x128xf32>
    %76 = arith.addf %68, %70 : vector<10x128xf32>
    %77 = arith.mulf %76, %71 : vector<10x128xf32>
    %78 = arith.addf %75, %77 : vector<10x128xf32>
    %79 = arith.divf %78, %73 : vector<10x128xf32>
    %cst_23 = arith.constant 4.000000e+00 : f32
    %80 = vector.broadcast %cst_23 : f32 to vector<10x128xf32>
    %81 = arith.addf %6, %80 : vector<10x128xf32>
    %cst_24 = arith.constant 5.000000e+00 : f32
    %82 = vector.broadcast %cst_24 : f32 to vector<10x128xf32>
    %83 = arith.addf %6, %82 : vector<10x128xf32>
    %cst_25 = arith.constant 6.000000e+00 : f32
    %84 = vector.broadcast %cst_25 : f32 to vector<10x128xf32>
    %85 = arith.addf %6, %84 : vector<10x128xf32>
    %cst_26 = arith.constant 7.000000e+00 : f32
    %86 = vector.broadcast %cst_26 : f32 to vector<10x128xf32>
    %87 = arith.addf %6, %86 : vector<10x128xf32>
    %88 = arith.mulf %81, %83 : vector<10x128xf32>
    %89 = arith.mulf %85, %87 : vector<10x128xf32>
    %90 = arith.mulf %88, %89 : vector<10x128xf32>
    %91 = arith.addf %81, %83 : vector<10x128xf32>
    %92 = arith.mulf %91, %89 : vector<10x128xf32>
    %93 = arith.addf %85, %87 : vector<10x128xf32>
    %94 = arith.mulf %93, %88 : vector<10x128xf32>
    %95 = arith.addf %92, %94 : vector<10x128xf32>
    %96 = arith.divf %95, %90 : vector<10x128xf32>
    %97 = arith.addf %79, %96 : vector<10x128xf32>
    %cst_27 = arith.constant 8.000000e+00 : f32
    %98 = vector.broadcast %cst_27 : f32 to vector<10x128xf32>
    %99 = arith.addf %6, %98 : vector<10x128xf32>
    %100 = math.log %99 : vector<10x128xf32>
    %101 = tpu.reciprocal %99 {approx = true} : vector<10x128xf32> -> vector<10x128xf32>
    %102 = arith.mulf %99, %101 : vector<10x128xf32>
    %cst_28 = arith.constant 2.000000e+00 : f32
    %103 = vector.broadcast %cst_28 : f32 to vector<10x128xf32>
    %104 = arith.subf %103, %102 : vector<10x128xf32>
    %105 = arith.mulf %101, %104 : vector<10x128xf32>
    %106 = arith.mulf %105, %105 : vector<10x128xf32>
    %cst_29 = arith.constant 5.000000e-01 : f32
    %107 = vector.broadcast %cst_29 : f32 to vector<10x128xf32>
    %108 = arith.mulf %107, %105 : vector<10x128xf32>
    %109 = arith.subf %100, %108 : vector<10x128xf32>
    %cst_30 = arith.constant 0.0039682542 : f32
    %110 = vector.broadcast %cst_30 : f32 to vector<10x128xf32>
    %111 = arith.mulf %106, %110 : vector<10x128xf32>
    %cst_31 = arith.constant 0.00833333377 : f32
    %112 = vector.broadcast %cst_31 : f32 to vector<10x128xf32>
    %113 = arith.subf %112, %111 : vector<10x128xf32>
    %114 = arith.mulf %106, %113 : vector<10x128xf32>
    %cst_32 = arith.constant 0.0833333358 : f32
    %115 = vector.broadcast %cst_32 : f32 to vector<10x128xf32>
    %116 = arith.subf %115, %114 : vector<10x128xf32>
    %117 = arith.mulf %106, %116 : vector<10x128xf32>
    %118 = arith.subf %109, %117 : vector<10x128xf32>
    %119 = arith.subf %118, %97 : vector<10x128xf32>
    %cst_33 = arith.constant dense<0.000000e+00> : vector<128xf32>
    %120 = vector.multi_reduction <add>, %119, %cst_33 [0] : vector<10x128xf32> to vector<128xf32>
    %121 = vector.shape_cast %120 : vector<128xf32> to vector<1x128xf32>
    %cst_34 = arith.constant 1.000000e-01 : f32
    %122 = vector.broadcast %cst_34 : f32 to vector<1x128xf32>
    %123 = arith.mulf %121, %122 : vector<1x128xf32>
    %124 = arith.subf %64, %123 : vector<1x128xf32>
    %125 = arith.mulf %7, %124 : vector<1x128xf32>
    %126 = tpu.iota {dimensions = array<i32: 0>} : vector<10x128xi32>
    %127 = vector.broadcast %5 : vector<1x128xi32> to vector<10x128xi32>
    %128 = arith.cmpi eq, %126, %127 : vector<10x128xi32>
    %cst_35 = arith.constant 1.000000e+00 : f32
    %129 = vector.broadcast %cst_35 : f32 to vector<10x128xf32>
    %130 = arith.select %128, %129, %6 : vector<10x128xi1>, vector<10x128xf32>
    %cst_36 = arith.constant 9.99999997E-7 : f32
    %131 = vector.broadcast %cst_36 : f32 to vector<10x128xf32>
    %132 = arith.addf %130, %131 : vector<10x128xf32>
    %cst_37 = arith.constant dense<0.000000e+00> : vector<128xf32>
    %133 = vector.multi_reduction <add>, %132, %cst_37 [0] : vector<10x128xf32> to vector<128xf32>
    %134 = vector.shape_cast %133 : vector<128xf32> to vector<1x128xf32>
    %cst_38 = arith.constant 1.000000e+00 : f32
    %135 = vector.broadcast %cst_38 : f32 to vector<10x128xf32>
    %136 = arith.addf %132, %135 : vector<10x128xf32>
    %cst_39 = arith.constant 2.000000e+00 : f32
    %137 = vector.broadcast %cst_39 : f32 to vector<10x128xf32>
    %138 = arith.addf %132, %137 : vector<10x128xf32>
    %cst_40 = arith.constant 3.000000e+00 : f32
    %139 = vector.broadcast %cst_40 : f32 to vector<10x128xf32>
    %140 = arith.addf %132, %139 : vector<10x128xf32>
    %141 = arith.mulf %132, %136 : vector<10x128xf32>
    %142 = arith.mulf %138, %140 : vector<10x128xf32>
    %143 = arith.mulf %141, %142 : vector<10x128xf32>
    %144 = arith.addf %132, %136 : vector<10x128xf32>
    %145 = arith.mulf %144, %142 : vector<10x128xf32>
    %146 = arith.addf %138, %140 : vector<10x128xf32>
    %147 = arith.mulf %146, %141 : vector<10x128xf32>
    %148 = arith.addf %145, %147 : vector<10x128xf32>
    %149 = arith.divf %148, %143 : vector<10x128xf32>
    %150 = math.log %143 : vector<10x128xf32>
    %cst_41 = arith.constant 4.000000e+00 : f32
    %151 = vector.broadcast %cst_41 : f32 to vector<10x128xf32>
    %152 = arith.addf %132, %151 : vector<10x128xf32>
    %cst_42 = arith.constant 5.000000e+00 : f32
    %153 = vector.broadcast %cst_42 : f32 to vector<10x128xf32>
    %154 = arith.addf %132, %153 : vector<10x128xf32>
    %cst_43 = arith.constant 6.000000e+00 : f32
    %155 = vector.broadcast %cst_43 : f32 to vector<10x128xf32>
    %156 = arith.addf %132, %155 : vector<10x128xf32>
    %cst_44 = arith.constant 7.000000e+00 : f32
    %157 = vector.broadcast %cst_44 : f32 to vector<10x128xf32>
    %158 = arith.addf %132, %157 : vector<10x128xf32>
    %159 = arith.mulf %152, %154 : vector<10x128xf32>
    %160 = arith.mulf %156, %158 : vector<10x128xf32>
    %161 = arith.mulf %159, %160 : vector<10x128xf32>
    %162 = arith.addf %152, %154 : vector<10x128xf32>
    %163 = arith.mulf %162, %160 : vector<10x128xf32>
    %164 = arith.addf %156, %158 : vector<10x128xf32>
    %165 = arith.mulf %164, %159 : vector<10x128xf32>
    %166 = arith.addf %163, %165 : vector<10x128xf32>
    %167 = arith.divf %166, %161 : vector<10x128xf32>
    %168 = arith.addf %149, %167 : vector<10x128xf32>
    %169 = math.log %161 : vector<10x128xf32>
    %170 = arith.addf %150, %169 : vector<10x128xf32>
    %cst_45 = arith.constant 8.000000e+00 : f32
    %171 = vector.broadcast %cst_45 : f32 to vector<10x128xf32>
    %172 = arith.addf %132, %171 : vector<10x128xf32>
    %173 = math.log %172 : vector<10x128xf32>
    %174 = tpu.reciprocal %172 {approx = true} : vector<10x128xf32> -> vector<10x128xf32>
    %175 = arith.mulf %172, %174 : vector<10x128xf32>
    %cst_46 = arith.constant 2.000000e+00 : f32
    %176 = vector.broadcast %cst_46 : f32 to vector<10x128xf32>
    %177 = arith.subf %176, %175 : vector<10x128xf32>
    %178 = arith.mulf %174, %177 : vector<10x128xf32>
    %179 = arith.mulf %178, %178 : vector<10x128xf32>
    %cst_47 = arith.constant 5.000000e-01 : f32
    %180 = vector.broadcast %cst_47 : f32 to vector<10x128xf32>
    %181 = arith.mulf %180, %178 : vector<10x128xf32>
    %182 = arith.subf %173, %181 : vector<10x128xf32>
    %cst_48 = arith.constant 0.0039682542 : f32
    %183 = vector.broadcast %cst_48 : f32 to vector<10x128xf32>
    %184 = arith.mulf %179, %183 : vector<10x128xf32>
    %cst_49 = arith.constant 0.00833333377 : f32
    %185 = vector.broadcast %cst_49 : f32 to vector<10x128xf32>
    %186 = arith.subf %185, %184 : vector<10x128xf32>
    %187 = arith.mulf %179, %186 : vector<10x128xf32>
    %cst_50 = arith.constant 0.0833333358 : f32
    %188 = vector.broadcast %cst_50 : f32 to vector<10x128xf32>
    %189 = arith.subf %188, %187 : vector<10x128xf32>
    %190 = arith.mulf %179, %189 : vector<10x128xf32>
    %191 = arith.subf %182, %190 : vector<10x128xf32>
    %192 = arith.subf %191, %168 : vector<10x128xf32>
    %cst_51 = arith.constant 5.000000e-01 : f32
    %193 = vector.broadcast %cst_51 : f32 to vector<10x128xf32>
    %194 = arith.subf %172, %193 : vector<10x128xf32>
    %195 = arith.mulf %194, %173 : vector<10x128xf32>
    %196 = arith.subf %195, %172 : vector<10x128xf32>
    %cst_52 = arith.constant 0.918938517 : f32
    %197 = vector.broadcast %cst_52 : f32 to vector<10x128xf32>
    %198 = arith.addf %196, %197 : vector<10x128xf32>
    %cst_53 = arith.constant 7.93650805E-4 : f32
    %199 = vector.broadcast %cst_53 : f32 to vector<10x128xf32>
    %200 = arith.mulf %179, %199 : vector<10x128xf32>
    %cst_54 = arith.constant 0.00277777785 : f32
    %201 = vector.broadcast %cst_54 : f32 to vector<10x128xf32>
    %202 = arith.subf %201, %200 : vector<10x128xf32>
    %203 = arith.mulf %179, %202 : vector<10x128xf32>
    %cst_55 = arith.constant 0.0833333358 : f32
    %204 = vector.broadcast %cst_55 : f32 to vector<10x128xf32>
    %205 = arith.subf %204, %203 : vector<10x128xf32>
    %206 = arith.mulf %178, %205 : vector<10x128xf32>
    %207 = arith.addf %198, %206 : vector<10x128xf32>
    %208 = arith.subf %207, %170 : vector<10x128xf32>
    %cst_56 = arith.constant 1.000000e+00 : f32
    %209 = vector.broadcast %cst_56 : f32 to vector<1x128xf32>
    %210 = arith.addf %134, %209 : vector<1x128xf32>
    %cst_57 = arith.constant 2.000000e+00 : f32
    %211 = vector.broadcast %cst_57 : f32 to vector<1x128xf32>
    %212 = arith.addf %134, %211 : vector<1x128xf32>
    %cst_58 = arith.constant 3.000000e+00 : f32
    %213 = vector.broadcast %cst_58 : f32 to vector<1x128xf32>
    %214 = arith.addf %134, %213 : vector<1x128xf32>
    %215 = arith.mulf %134, %210 : vector<1x128xf32>
    %216 = arith.mulf %212, %214 : vector<1x128xf32>
    %217 = arith.mulf %215, %216 : vector<1x128xf32>
    %218 = arith.addf %134, %210 : vector<1x128xf32>
    %219 = arith.mulf %218, %216 : vector<1x128xf32>
    %220 = arith.addf %212, %214 : vector<1x128xf32>
    %221 = arith.mulf %220, %215 : vector<1x128xf32>
    %222 = arith.addf %219, %221 : vector<1x128xf32>
    %223 = arith.divf %222, %217 : vector<1x128xf32>
    %224 = math.log %217 : vector<1x128xf32>
    %cst_59 = arith.constant 4.000000e+00 : f32
    %225 = vector.broadcast %cst_59 : f32 to vector<1x128xf32>
    %226 = arith.addf %134, %225 : vector<1x128xf32>
    %cst_60 = arith.constant 5.000000e+00 : f32
    %227 = vector.broadcast %cst_60 : f32 to vector<1x128xf32>
    %228 = arith.addf %134, %227 : vector<1x128xf32>
    %cst_61 = arith.constant 6.000000e+00 : f32
    %229 = vector.broadcast %cst_61 : f32 to vector<1x128xf32>
    %230 = arith.addf %134, %229 : vector<1x128xf32>
    %cst_62 = arith.constant 7.000000e+00 : f32
    %231 = vector.broadcast %cst_62 : f32 to vector<1x128xf32>
    %232 = arith.addf %134, %231 : vector<1x128xf32>
    %233 = arith.mulf %226, %228 : vector<1x128xf32>
    %234 = arith.mulf %230, %232 : vector<1x128xf32>
    %235 = arith.mulf %233, %234 : vector<1x128xf32>
    %236 = arith.addf %226, %228 : vector<1x128xf32>
    %237 = arith.mulf %236, %234 : vector<1x128xf32>
    %238 = arith.addf %230, %232 : vector<1x128xf32>
    %239 = arith.mulf %238, %233 : vector<1x128xf32>
    %240 = arith.addf %237, %239 : vector<1x128xf32>
    %241 = arith.divf %240, %235 : vector<1x128xf32>
    %242 = arith.addf %223, %241 : vector<1x128xf32>
    %243 = math.log %235 : vector<1x128xf32>
    %244 = arith.addf %224, %243 : vector<1x128xf32>
    %cst_63 = arith.constant 8.000000e+00 : f32
    %245 = vector.broadcast %cst_63 : f32 to vector<1x128xf32>
    %246 = arith.addf %134, %245 : vector<1x128xf32>
    %247 = math.log %246 : vector<1x128xf32>
    %248 = tpu.reciprocal %246 {approx = true} : vector<1x128xf32> -> vector<1x128xf32>
    %249 = arith.mulf %246, %248 : vector<1x128xf32>
    %cst_64 = arith.constant 2.000000e+00 : f32
    %250 = vector.broadcast %cst_64 : f32 to vector<1x128xf32>
    %251 = arith.subf %250, %249 : vector<1x128xf32>
    %252 = arith.mulf %248, %251 : vector<1x128xf32>
    %253 = arith.mulf %252, %252 : vector<1x128xf32>
    %cst_65 = arith.constant 5.000000e-01 : f32
    %254 = vector.broadcast %cst_65 : f32 to vector<1x128xf32>
    %255 = arith.mulf %254, %252 : vector<1x128xf32>
    %256 = arith.subf %247, %255 : vector<1x128xf32>
    %cst_66 = arith.constant 0.0039682542 : f32
    %257 = vector.broadcast %cst_66 : f32 to vector<1x128xf32>
    %258 = arith.mulf %253, %257 : vector<1x128xf32>
    %cst_67 = arith.constant 0.00833333377 : f32
    %259 = vector.broadcast %cst_67 : f32 to vector<1x128xf32>
    %260 = arith.subf %259, %258 : vector<1x128xf32>
    %261 = arith.mulf %253, %260 : vector<1x128xf32>
    %cst_68 = arith.constant 0.0833333358 : f32
    %262 = vector.broadcast %cst_68 : f32 to vector<1x128xf32>
    %263 = arith.subf %262, %261 : vector<1x128xf32>
    %264 = arith.mulf %253, %263 : vector<1x128xf32>
    %265 = arith.subf %256, %264 : vector<1x128xf32>
    %266 = arith.subf %265, %242 : vector<1x128xf32>
    %cst_69 = arith.constant 5.000000e-01 : f32
    %267 = vector.broadcast %cst_69 : f32 to vector<1x128xf32>
    %268 = arith.subf %246, %267 : vector<1x128xf32>
    %269 = arith.mulf %268, %247 : vector<1x128xf32>
    %270 = arith.subf %269, %246 : vector<1x128xf32>
    %cst_70 = arith.constant 0.918938517 : f32
    %271 = vector.broadcast %cst_70 : f32 to vector<1x128xf32>
    %272 = arith.addf %270, %271 : vector<1x128xf32>
    %cst_71 = arith.constant 7.93650805E-4 : f32
    %273 = vector.broadcast %cst_71 : f32 to vector<1x128xf32>
    %274 = arith.mulf %253, %273 : vector<1x128xf32>
    %cst_72 = arith.constant 0.00277777785 : f32
    %275 = vector.broadcast %cst_72 : f32 to vector<1x128xf32>
    %276 = arith.subf %275, %274 : vector<1x128xf32>
    %277 = arith.mulf %253, %276 : vector<1x128xf32>
    %cst_73 = arith.constant 0.0833333358 : f32
    %278 = vector.broadcast %cst_73 : f32 to vector<1x128xf32>
    %279 = arith.subf %278, %277 : vector<1x128xf32>
    %280 = arith.mulf %252, %279 : vector<1x128xf32>
    %281 = arith.addf %272, %280 : vector<1x128xf32>
    %282 = arith.subf %281, %244 : vector<1x128xf32>
    %cst_74 = arith.constant dense<0.000000e+00> : vector<128xf32>
    %283 = vector.multi_reduction <add>, %208, %cst_74 [0] : vector<10x128xf32> to vector<128xf32>
    %284 = vector.shape_cast %283 : vector<128xf32> to vector<1x128xf32>
    %cst_75 = arith.constant 1.000000e+00 : f32
    %285 = vector.broadcast %cst_75 : f32 to vector<10x128xf32>
    %286 = arith.subf %132, %285 : vector<10x128xf32>
    %287 = arith.mulf %286, %192 : vector<10x128xf32>
    %cst_76 = arith.constant dense<0.000000e+00> : vector<128xf32>
    %288 = vector.multi_reduction <add>, %287, %cst_76 [0] : vector<10x128xf32> to vector<128xf32>
    %289 = vector.shape_cast %288 : vector<128xf32> to vector<1x128xf32>
    %290 = arith.subf %282, %284 : vector<1x128xf32>
    %cst_77 = arith.constant 12.8018274 : f32
    %291 = vector.broadcast %cst_77 : f32 to vector<1x128xf32>
    %292 = arith.subf %290, %291 : vector<1x128xf32>
    %293 = arith.addf %292, %289 : vector<1x128xf32>
    %cst_78 = arith.constant 1.000000e+01 : f32
    %294 = vector.broadcast %cst_78 : f32 to vector<1x128xf32>
    %295 = arith.subf %134, %294 : vector<1x128xf32>
    %296 = arith.mulf %266, %295 : vector<1x128xf32>
    %297 = arith.subf %293, %296 : vector<1x128xf32>
    %cst_79 = arith.constant 1.000000e+00 : f32
    %298 = vector.broadcast %cst_79 : f32 to vector<1x128xf32>
    %299 = arith.mulf %298, %297 : vector<1x128xf32>
    %300 = arith.addf %125, %299 : vector<1x128xf32>
    %c128_i32 = arith.constant 128 : i32
    %301 = arith.muli %arg0, %c128_i32 : i32
    %302 = tpu.iota {dimensions = array<i32: 1>} : vector<1x128xi32>
    %303 = vector.broadcast %301 : i32 to vector<1x128xi32>
    %304 = arith.addi %303, %302 : vector<1x128xi32>
    %c16_i32 = arith.constant 16 : i32
    %305 = vector.broadcast %c16_i32 : i32 to vector<1x128xi32>
    %306 = arith.cmpi slt, %304, %305 : vector<1x128xi32>
    %cst_80 = arith.constant 0.000000e+00 : f32
    %307 = vector.broadcast %cst_80 : f32 to vector<1x128xf32>
    %308 = arith.select %306, %300, %307 : vector<1x128xi1>, vector<1x128xf32>
    %c0_81 = arith.constant 0 : index
    %c0_82 = arith.constant 0 : index
    %309 = vector.load %arg3[%c0_81, %c0_82] : memref<1x128xf32, #tpu.memory_space<vmem>>, vector<1x128xf32>
    tpu.vector_store %arg3[%c0_81, %c0_82], %308 {strides = array<i32>} : memref<1x128xf32, #tpu.memory_space<vmem>>, vector<1x128xf32>,
    return
  }
  func.func @transform_0(%arg0: i32) -> (i32, i32) {
    %c0_i32 = arith.constant 0 : i32
    %c0_i32_0 = arith.constant 0 : i32
    return %arg0, %c0_i32 : i32, i32
  }
  func.func @transform_1(%arg0: i32) -> (i32, i32) {
    %c0_i32 = arith.constant 0 : i32
    %c0_i32_0 = arith.constant 0 : i32
    return %c0_i32, %arg0 : i32, i32
  }
  func.func @transform_2(%arg0: i32) -> (i32, i32) {
    %c0_i32 = arith.constant 0 : i32
    %c0_i32_0 = arith.constant 0 : i32
    return %c0_i32, %arg0 : i32, i32
  }
}

</mosaic_0001>

<bundles_post_ra>
// kernel: tpu_custom_call.1
= control target key start
LH: loop header
LB: loop body
LE: loop exit
PB: predicated region body
PF: predicated region fallthrough
CT: control target
= control target key end

     0   :  { %vm28_vm0 = vcmask 80896   ;;  %s972_s0 = inlined_call_operand.vmem [shape: f32[128,10], index: 0, kind: input, shape index: {}]   ;;  %s973_s1 = inlined_call_operand.vmem [shape: s32[1,128], index: 1, kind: input, shape index: {}]   ;;  %s974_s2 = inlined_call_operand.hbm [shape: f32[1,128], index: 2, kind: output, shape index: {}]  }
   0x1   :  { %v12_v0 = vld [vmem:[%s972_s0] sm:$0xff]  ;;  %v13_v1 = vld [vmem:[%s972_s0 + $0x8] sm:$0xff]  ;;  %v14_v2 = vld [vmem:[%s972_s0 + $0x10] sm:$0xff] }
   0x2   :  { %29 = vst.msk [vmem:[#allocation2] sm:$0xff] %vm28_vm0, %v12_v0  ;;  %30 = vst.msk [vmem:[#allocation2 + $0x8] sm:$0xff] %vm28_vm0, %v13_v1  ;;  %v15_v3 = vld [vmem:[%s972_s0 + $0x18] sm:$0xff]  ;;  %v16_v4 = vld [vmem:[%s972_s0 + $0x20] sm:$0xff] }
   0x3   :  { %31 = vst.msk [vmem:[#allocation2 + $0x10] sm:$0xff] %vm28_vm0, %v14_v2  ;;  %v17_v5 = vld [vmem:[%s972_s0 + $0x28] sm:$0xff]  ;;  %32 = vst.msk [vmem:[#allocation2 + $0x18] sm:$0xff] %vm28_vm0, %v15_v3  ;;  %v18_v6 = vld [vmem:[%s972_s0 + $0x30] sm:$0xff] }
   0x4   :  { %33 = vst.msk [vmem:[#allocation2 + $0x20] sm:$0xff] %vm28_vm0, %v16_v4  ;;  %34 = vst.msk [vmem:[#allocation2 + $0x28] sm:$0xff] %vm28_vm0, %v17_v5  ;;  %v19_v7 = vld [vmem:[%s972_s0 + $0x38] sm:$0xff]  ;;  %v20_v8 = vld [vmem:[%s972_s0 + $0x40] sm:$0xff] }
   0x5   :  { %35 = vst.msk [vmem:[#allocation2 + $0x30] sm:$0xff] %vm28_vm0, %v18_v6  ;;  %36 = vst.msk [vmem:[#allocation2 + $0x38] sm:$0xff] %vm28_vm0, %v19_v7  ;;  %v21_v9 = vld [vmem:[%s972_s0 + $0x48] sm:$0xff]  ;;  %v22_v10 = vld [vmem:[%s972_s0 + $0x50] sm:$0xff] }
   0x6   :  { %37 = vst.msk [vmem:[#allocation2 + $0x40] sm:$0xff] %vm28_vm0, %v20_v8  ;;  %v23_v11 = vld [vmem:[%s972_s0 + $0x58] sm:$0xff]  ;;  %38 = vst.msk [vmem:[#allocation2 + $0x48] sm:$0xff] %vm28_vm0, %v21_v9  ;;  %v24_v12 = vld [vmem:[%s972_s0 + $0x60] sm:$0xff] }
   0x7   :  { %39 = vst.msk [vmem:[#allocation2 + $0x50] sm:$0xff] %vm28_vm0, %v22_v10  ;;  %40 = vst.msk [vmem:[#allocation2 + $0x58] sm:$0xff] %vm28_vm0, %v23_v11  ;;  %v25_v13 = vld [vmem:[%s972_s0 + $0x68] sm:$0xff]  ;;  %v26_v14 = vld [vmem:[%s972_s0 + $0x70] sm:$0xff] }
   0x8   :  { %41 = vst.msk [vmem:[#allocation2 + $0x60] sm:$0xff] %vm28_vm0, %v24_v12  ;;  %42 = vst.msk [vmem:[#allocation2 + $0x68] sm:$0xff] %vm28_vm0, %v25_v13  ;;  %v27_v15 = vld [vmem:[%s972_s0 + $0x78] sm:$0xff] }
   0x9   :  { %43 = vst.msk [vmem:[#allocation2 + $0x70] sm:$0xff] %vm28_vm0, %v26_v14 }
   0xa   :  { %7 = vsyncpa [#allocation4], 0  ;;  %44 = vst.msk [vmem:[#allocation2 + $0x78] sm:$0xff] %vm28_vm0, %v27_v15  ;;  %v45_v16 = vld [vmem:[#allocation2] sm:$0xff]  ;;  %v46_v17 = vld [vmem:[#allocation2 + $0x8] sm:$0xff]  ;;  %vm99_vm1 = vcmask 1041408   ;;  %v975_v37 = vlaneseq }
   0xb   :  { %61 = vxpose.xlu0.b32.start [1/16] (narrow) %v45_v16, 16  ;;  %v47_v18 = vld [vmem:[#allocation2 + $0x10] sm:$0xff]  ;;  %v48_v19 = vld [vmem:[#allocation2 + $0x18] sm:$0xff]  ;;  %v49_v20 = vld [vmem:[#allocation2 + $0x20] sm:$0xff] }
   0xc   :  { %v50_v21 = vld [vmem:[#allocation2 + $0x28] sm:$0xff]  ;;  %v51_v22 = vld [vmem:[#allocation2 + $0x30] sm:$0xff]  ;;  %v52_v23 = vld [vmem:[#allocation2 + $0x38] sm:$0xff]  ;;  %v255_v42 = vshrl.u32 %v975_v37, 7 }
   0xd   :  { %v53_v24 = vld [vmem:[#allocation2 + $0x40] sm:$0xff]  ;;  %v54_v25 = vld [vmem:[#allocation2 + $0x48] sm:$0xff] }
   0xe   :  { %v55_v26 = vld [vmem:[#allocation2 + $0x50] sm:$0xff]  ;;  %v56_v27 = vld [vmem:[#allocation2 + $0x58] sm:$0xff]  ;;  %v259_v48 = vsub.s32 0, %v255_v42  ;;  %v688_v49 = vld [vmem:[%s973_s1] sm:$0x1]  ;;  %v256_v63 = vadd.s32 8, %v255_v42 }
   0xf   :  { %62 = vxpose.xlu0.b32.cont [2/16] (narrow) %v46_v17, 16  ;;  %v57_v28 = vld [vmem:[#allocation2 + $0x60] sm:$0xff]  ;;  %v58_v29 = vld [vmem:[#allocation2 + $0x68] sm:$0xff]  ;;  %s603_s1 = smov [#allocation3]  }
  0x10   :  { %v59_v30 = vld [vmem:[#allocation2 + $0x70] sm:$0xff]  ;;  %v260_v0 = vrot.slane %v688_v49, %v259_v48  ;;  %s499_s14 = sshll.u32 %s603_s1, 4  ;;  %s500_s14 = int_to_ptr.vmem [resolvable:$true] %s499_s14 }
  0x11   :  { %v60_v31 = vld [vmem:[#allocation2 + $0x78] sm:$0xff]  ;;  %s579_s15 = scalar_lea.vmem %s500_s14, 16  ;;  %s583_s16 = scalar_lea.vmem %s500_s14, 32 }
  0x12   :  { %vm261_vm2 = vcmp.eq.s32.totalorder %v255_v42, %v260_v0  ;;  %vm262_vm3 = vcmp.eq.s32.totalorder %v256_v63, %v260_v0  ;;  %p580_p0 = scmp.ne.s32.totalorder %s500_s14, %s579_s15  ;;  %p584_p1 = scmp.lt.s32.totalorder %s500_s14, %s500_s14 }
  0x13   :  { %63 = vxpose.xlu0.b32.cont [3/16] (narrow) %v47_v18, 16  ;;  %p585_p2 = scmp.lt.s32.totalorder %s583_s16, %s579_s15 }
  0x15   :  { %p586_p3 = por %p585_p2, %p584_p1 }
  0x17   :  { %64 = vxpose.xlu0.b32.cont [4/16] (narrow) %v48_v19, 16  ;;  %p587_p4 = pnand %p586_p3, %p580_p0 }
  0x1b   :  { %65 = vxpose.xlu0.b32.cont [5/16] (narrow) %v49_v20, 16 }
  0x1f   :  { %66 = vxpose.xlu0.b32.cont [6/16] (narrow) %v50_v21, 16 }
  0x23   :  { %67 = vxpose.xlu0.b32.cont [7/16] (narrow) %v51_v22, 16 }
  0x27   :  { %68 = vxpose.xlu0.b32.cont [8/16] (narrow) %v52_v23, 16 }
  0x2b   :  { %69 = vxpose.xlu0.b32.cont [9/16] (narrow) %v53_v24, 16 }
  0x2f   :  { %70 = vxpose.xlu0.b32.cont [10/16] (narrow) %v54_v25, 16 }
  0x33   :  { %71 = vxpose.xlu0.b32.cont [11/16] (narrow) %v55_v26, 16 }
  0x37   :  { %72 = vxpose.xlu0.b32.cont [12/16] (narrow) %v56_v27, 16 }
  0x3b   :  { %73 = vxpose.xlu0.b32.cont [13/16] (narrow) %v57_v28, 16 }
  0x3f   :  { %74 = vxpose.xlu0.b32.cont [14/16] (narrow) %v58_v29, 16 }
  0x43   :  { %75 = vxpose.xlu0.b32.cont [15/16] (narrow) %v59_v30, 16 }
  0x47   :  { %76 = vxpose.xlu0.b32.end [16/16] (narrow) %v60_v31, 16 }
  0x8b   :  { %v77_v32 = vpop.trf.xlu0 }
  0x8c   :  { %v94_v33 = vmul.f32 1.442695, %v77_v32 }
  0x8f   :  { %v78_v34 = vpop.trf.xlu0 }
  0x90   :  { %v96_v35 = vmul.f32 1.442695, %v78_v34 }
  0x92   :  { %515 = vpow2.f32 %v96_v35 }
  0x93   :  { %517 = vpow2.f32 %v94_v33 }
  0x9c   :  { %v516_v36 = vpop.eup %515 }
  0x9d   :  { %v518_v38 = vpop.eup %517  ;;  %v100_v39 = vsel %vm99_vm1, %v516_v36, 0.0  ;;  %v154_v50 = vadd.f32 1.0, %v516_v36  ;;  %v156_v55 = vadd.f32 2.0, %v516_v36  ;;  %v158_v56 = vadd.f32 3.0, %v516_v36 }
  0x9e   :  { %v101_v40 = vadd.f32 %v518_v38, %v100_v39  ;;  %v153_v43 = vadd.f32 1.0, %v518_v38  ;;  %v155_v44 = vadd.f32 2.0, %v518_v38  ;;  %v157_v45 = vadd.f32 3.0, %v518_v38 }
  0x9f   :  { %v690_v53 = vadd.f32 8.0, %v518_v38  ;;  %v180_v57 = vadd.f32 4.0, %v516_v36  ;;  %v182_v58 = vadd.f32 5.0, %v516_v36  ;;  %v184_v59 = vadd.f32 6.0, %v516_v36 }
  0xa0   :  { %v102_v41 = vrot.slane %v101_v40, 4  ;;  %v159_v51 = vmul.f32 %v518_v38, %v153_v43  ;;  %v161_v52 = vmul.f32 %v157_v45, %v155_v44  ;;  %v186_v60 = vadd.f32 7.0, %v516_v36 }
  0xa1   :  { %v210_v61 = vadd.f32 8.0, %v516_v36  ;;  %v179_v1 = vadd.f32 4.0, %v518_v38  ;;  %v181_v2 = vadd.f32 5.0, %v518_v38  ;;  %v183_v3 = vadd.f32 6.0, %v518_v38 }
  0xa2   :  { %v103_v46 = vadd.f32 %v102_v41, %v101_v40  ;;  %v185_v4 = vadd.f32 7.0, %v518_v38  ;;  %v160_v6 = vmul.f32 %v516_v36, %v154_v50  ;;  %v162_v7 = vmul.f32 %v158_v56, %v156_v55 }
  0xa3   :  { %519 = vrcp.f32 %v690_v53  ;;  %v163_v8 = vmul.f32 %v161_v52, %v159_v51  ;;  %v188_v9 = vmul.f32 %v182_v58, %v180_v57  ;;  %v190_v10 = vmul.f32 %v186_v60, %v184_v59 }
  0xa4   :  { %v104_v47 = vrot.slane %v103_v46, 2  ;;  %521 = vrcp.f32 %v210_v61  ;;  %v165_v11 = vadd.f32 %v518_v38, %v153_v43  ;;  %v169_v12 = vadd.f32 %v157_v45, %v155_v44 }
  0xa5   :  { %v166_v14 = vadd.f32 %v516_v36, %v154_v50  ;;  %v170_v15 = vadd.f32 %v158_v56, %v156_v55  ;;  %v187_v16 = vmul.f32 %v181_v2, %v179_v1  ;;  %v164_v17 = vmul.f32 %v162_v7, %v160_v6 }
  0xa6   :  { %v105_v54 = vadd.f32 %v104_v47, %v103_v46  ;;  %v189_v18 = vmul.f32 %v185_v4, %v183_v3  ;;  %v193_v19 = vadd.f32 %v181_v2, %v179_v1  ;;  %v197_v20 = vadd.f32 %v185_v4, %v183_v3 }
  0xa7   :  { %523 = vrcp.f32 %v163_v8  ;;  %v192_v21 = vmul.f32 %v190_v10, %v188_v9  ;;  %v194_v22 = vadd.f32 %v182_v58, %v180_v57  ;;  %v198_v23 = vadd.f32 %v186_v60, %v184_v59 }
  0xa8   :  { %v106_v62 = vrot.slane %v105_v54, 1  ;;  %v167_v24 = vmul.f32 %v165_v11, %v161_v52  ;;  %v171_v25 = vmul.f32 %v169_v12, %v159_v51  ;;  %v264_v26 = vsel %vm262_vm3, 1.0, %v516_v36 }
  0xa9   :  { %v168_v27 = vmul.f32 %v166_v14, %v162_v7  ;;  %v172_v28 = vmul.f32 %v170_v15, %v160_v6  ;;  %v263_v29 = vsel %vm261_vm2, 1.0, %v518_v38  ;;  %v191_v30 = vmul.f32 %v189_v18, %v187_v16 }
  0xaa   :  { %v693_v5 = vadd.f32 %v106_v62, %v105_v54  ;;  %v195_v31 = vmul.f32 %v193_v19, %v189_v18  ;;  %v199_v32 = vmul.f32 %v197_v20, %v187_v16  ;;  %v196_v33 = vmul.f32 %v194_v22, %v190_v10 }
  0xab   :  { %v200_v34 = vmul.f32 %v198_v23, %v188_v9  ;;  %v701_v35 = vadd.f32 1e-06, %v264_v26  ;;  %v703_v40 = vadd.f32 1e-06, %v263_v29  ;;  %v173_v41 = vadd.f32 %v171_v25, %v167_v24 }
  0xac   :  { %v697_v13 = vadd.f32 8.0, %v693_v5  ;;  %v174_v44 = vadd.f32 %v172_v28, %v168_v27  ;;  %v706_v42 = vadd.f32 %v199_v32, %v195_v31  ;;  %v108_v48 = vadd.f32 1.0, %v693_v5 }
  0xad   :  { %v520_v39 = vpop.eup %519  ;;  %v202_v45 = vadd.f32 %v200_v34, %v196_v33  ;;  %v267_v47 = vsel %vm99_vm1, %v701_v35, 0.0  ;;  %v713_v51 = vadd.f32 1.0, %v703_v40  ;;  %v716_v52 = vadd.f32 2.0, %v703_v40 }
  0xae   :  { %525 = vrcp.f32 %v697_v13  ;;  %v522_v36 = vpop.eup %521  ;;  %v217_v43 = vmul.f32 %v520_v39, %v690_v53  ;;  %v109_v55 = vadd.f32 2.0, %v693_v5  ;;  %v110_v56 = vadd.f32 3.0, %v693_v5 }
  0xaf   :  { %527 = vrcp.f32 %v164_v17  ;;  %v218_v38 = vmul.f32 %v522_v36, %v210_v61  ;;  %v121_v58 = vadd.f32 4.0, %v693_v5  ;;  %v122_v59 = vadd.f32 5.0, %v693_v5 }
  0xb0   :  { %529 = vrcp.f32 %v192_v21  ;;  %v219_v46 = vsub.f32 2.0, %v217_v43  ;;  %v123_v63 = vadd.f32 6.0, %v693_v5  ;;  %v124_v0 = vadd.f32 7.0, %v693_v5 }
  0xb1   :  { %531 = vlog2.f32 %v210_v61  ;;  %v220_v50 = vsub.f32 2.0, %v218_v38  ;;  %v524_v54 = vpop.eup %523  ;;  %v268_v61 = vadd.f32 %v267_v47, %v703_v40  ;;  %v729_v2 = vadd.f32 1.0, %v701_v35 }
  0xb2   :  { %533 = vrcp.f32 %v191_v30  ;;  %v221_v57 = vmul.f32 %v520_v39, %v219_v46  ;;  %v732_v4 = vmul.f32 %v108_v48, %v693_v5  ;;  %v734_v6 = vmul.f32 %v524_v54, %v173_v41 }
  0xb3   :  { %535 = vlog2.f32 %v690_v53  ;;  %v721_v53 = vadd.f32 3.0, %v703_v40  ;;  %v222_v60 = vmul.f32 %v522_v36, %v220_v50  ;;  %v737_v8 = vadd.f32 2.0, %v701_v35 }
  0xb4   :  { %v223_v1 = vmul.f32 %v221_v57, %v221_v57  ;;  %v112_v10 = vmul.f32 %v110_v56, %v109_v55  ;;  %v114_v11 = vadd.f32 %v108_v48, %v693_v5  ;;  %v116_v16 = vadd.f32 %v110_v56, %v109_v55 }
  0xb5   :  { %v224_v7 = vmul.f32 %v222_v60, %v222_v60  ;;  %v741_v17 = vmul.f32 %v122_v59, %v121_v58  ;;  %v269_v19 = vrot.slane %v268_v61, 4  ;;  %v743_v20 = vmul.f32 %v124_v0, %v123_v63 }
  0xb6   :  { %v229_v14 = vmul.f32 0.003968254, %v223_v1  ;;  %v745_v21 = vadd.f32 %v122_v59, %v121_v58  ;;  %v748_v23 = vadd.f32 3.0, %v701_v35  ;;  %v750_v25 = vadd.f32 %v124_v0, %v123_v63 }
  0xb7   :  { %v230_v18 = vmul.f32 0.003968254, %v224_v7  ;;  %v754_v32 = vmul.f32 %v713_v51, %v703_v40  ;;  %v226_v33 = vmul.f32 0.5, %v222_v60  ;;  %v270_v39 = vadd.f32 %v269_v19, %v268_v61 }
  0xb8   :  { %v526_v62 = vpop.eup %525  ;;  %v231_v22 = vsub.f32 0.008333334, %v229_v14  ;;  %v758_v36 = vmul.f32 %v729_v2, %v701_v35  ;;  %v283_v43 = vmul.f32 %v721_v53, %v716_v52  ;;  %v767_v38 = vadd.f32 4.0, %v703_v40 }
  0xb9   :  { %v528_v3 = vpop.eup %527  ;;  %v140_v12 = vmul.f32 %v526_v62, %v697_v13  ;;  %v232_v27 = vsub.f32 0.008333334, %v230_v18  ;;  %v770_v46 = vadd.f32 5.0, %v703_v40  ;;  %v773_v47 = vadd.f32 6.0, %v703_v40 }
  0xba   :  { %v530_v9 = vpop.eup %529  ;;  %v178_v5 = vmul.f32 %v528_v3, %v174_v44  ;;  %v233_v31 = vmul.f32 %v231_v22, %v223_v1  ;;  %v764_v44 = vmul.f32 %v748_v23, %v737_v8  ;;  %v776_v48 = vadd.f32 7.0, %v703_v40 }
  0xbb   :  { %v532_v15 = vpop.eup %531  ;;  %v206_v26 = vmul.f32 %v530_v9, %v202_v45  ;;  %v141_v29 = vsub.f32 2.0, %v140_v12  ;;  %v234_v34 = vmul.f32 %v232_v27, %v224_v7  ;;  %v113_v50 = vmul.f32 %v112_v10, %v732_v4 }
  0xbc   :  { %v534_v24 = vpop.eup %533  ;;  %v214_v30 = vmul.f32 0.6931472, %v532_v15  ;;  %v235_v41 = vsub.f32 0.083333336, %v233_v31  ;;  %537 = vlog2.f32 %v697_v13  ;;  %v225_v55 = vmul.f32 0.5, %v221_v57 }
  0xbd   :  { %v536_v28 = vpop.eup %535  ;;  %v236_v45 = vsub.f32 0.083333336, %v234_v34  ;;  %v780_v54 = vmul.f32 %v526_v62, %v141_v29  ;;  %v204_v56 = vmul.f32 %v534_v24, %v706_v42  ;;  %v208_v61 = vadd.f32 %v206_v26, %v178_v5 }
  0xbe   :  { %v212_v58 = vmul.f32 0.6931472, %v536_v28  ;;  %v228_v59 = vsub.f32 %v214_v30, %v226_v33  ;;  %v237_v63 = vmul.f32 %v235_v41, %v223_v1  ;;  %v271_v0 = vrot.slane %v270_v39, 2 }
  0xbf   :  { %v238_v60 = vmul.f32 %v236_v45, %v224_v7  ;;  %v285_v3 = vmul.f32 %v283_v43, %v754_v32  ;;  %v286_v12 = vmul.f32 %v764_v44, %v758_v36  ;;  %v788_v13 = vmul.f32 %v770_v46, %v767_v38 }
  0xc0   :  { %v792_v57 = vmul.f32 %v776_v48, %v773_v47  ;;  %539 = vrcp.f32 %v113_v50  ;;  %v796_v42 = vmul.f32 %v780_v54, %v780_v54  ;;  %v227_v62 = vsub.f32 %v212_v58, %v225_v55 }
  0xc1   :  { %v240_v9 = vsub.f32 %v228_v59, %v238_v60  ;;  %v306_v1 = vadd.f32 4.0, %v701_v35  ;;  %v308_v14 = vadd.f32 5.0, %v701_v35  ;;  %v310_v15 = vadd.f32 6.0, %v701_v35 }
  0xc2   :  { %v312_v18 = vadd.f32 7.0, %v701_v35  ;;  %v115_v19 = vmul.f32 %v114_v11, %v112_v10  ;;  %v239_v22 = vsub.f32 %v227_v62, %v237_v63  ;;  %v272_v24 = vadd.f32 %v271_v0, %v270_v39 }
  0xc3   :  { %v242_v7 = vsub.f32 %v240_v9, %v208_v61  ;;  %541 = vrcp.f32 %v285_v3  ;;  %v117_v5 = vmul.f32 %v116_v16, %v732_v4  ;;  %v207_v26 = vadd.f32 %v204_v56, %v734_v6 }
  0xc4   :  { %543 = vrcp.f32 %v286_v12  ;;  %v317_v27 = vmul.f32 %v792_v57, %v788_v13  ;;  %v287_v28 = vadd.f32 %v713_v51, %v703_v40  ;;  %v291_v29 = vadd.f32 %v721_v53, %v716_v52 }
  0xc5   :  { %545 = vlog2.f32 %v285_v3  ;;  %v811_v10 = vadd.f32 8.0, %v703_v40  ;;  %v146_v11 = vmul.f32 0.003968254, %v796_v42  ;;  %v243_v4 = vsel %vm99_vm1, %v242_v7, 0.0 }
  0xc6   :  { %v314_v16 = vmul.f32 %v308_v14, %v306_v1  ;;  %v316_v6 = vmul.f32 %v312_v18, %v310_v15  ;;  %v538_v30 = vpop.eup %537  ;;  %v241_v31 = vsub.f32 %v239_v22, %v207_v26  ;;  %v273_v33 = vrot.slane %v272_v24, 1 }
  0xc7   :  { %547 = vlog2.f32 %v286_v12  ;;  %v816_v34 = vadd.f32 8.0, %v701_v35  ;;  %v127_v51 = vmul.f32 %v743_v20, %v741_v17  ;;  %v129_v52 = vmul.f32 %v745_v21, %v743_v20 }
  0xc8   :  { %v131_v53 = vmul.f32 %v750_v25, %v741_v17  ;;  %549 = vrcp.f32 %v317_v27  ;;  %v244_v39 = vadd.f32 %v243_v4, %v241_v31  ;;  %v288_v41 = vadd.f32 %v729_v2, %v701_v35 }
  0xc9   :  { %v292_v45 = vadd.f32 %v748_v23, %v737_v8  ;;  %551 = vlog2.f32 %v811_v10  ;;  %v147_v50 = vsub.f32 0.008333334, %v146_v11  ;;  %v289_v55 = vmul.f32 %v287_v28, %v283_v43 }
  0xca   :  { %v318_v56 = vmul.f32 %v316_v6, %v314_v16  ;;  %553 = vrcp.f32 %v811_v10  ;;  %v830_v58 = vpop.eup %539  ;;  %v832_v20 = vadd.f32 %v273_v33, %v272_v24  ;;  %v293_v17 = vmul.f32 %v291_v29, %v754_v32 }
  0xcb   :  { %v319_v21 = vadd.f32 %v770_v46, %v767_v38  ;;  %555 = vrcp.f32 %v816_v34  ;;  %v320_v2 = vadd.f32 %v308_v14, %v306_v1  ;;  %v323_v8 = vadd.f32 %v776_v48, %v773_v47 }
  0xcc   :  { %v324_v23 = vadd.f32 %v312_v18, %v310_v15  ;;  %557 = vlog2.f32 %v816_v34  ;;  %v245_v43 = vrot.slane %v244_v39, 4  ;;  %v290_v59 = vmul.f32 %v288_v41, %v764_v44 }
  0xcd   :  { %v542_v25 = vpop.eup %541  ;;  %559 = vrcp.f32 %v127_v51  ;;  %v294_v60 = vmul.f32 %v292_v45, %v758_v36  ;;  %v843_v61 = vadd.f32 %v117_v5, %v115_v19  ;;  %v845_v38 = vadd.f32 %v131_v53, %v129_v52 }
  0xce   :  { %v544_v32 = vpop.eup %543  ;;  %v848_v46 = vmul.f32 %v147_v50, %v796_v42  ;;  %561 = vrcp.f32 %v318_v56  ;;  %v295_v48 = vadd.f32 %v293_v17, %v289_v55  ;;  %v397_v63 = vadd.f32 1.0, %v832_v20 }
  0xcf   :  { %v546_v47 = vpop.eup %545  ;;  %v398_v0 = vadd.f32 2.0, %v832_v20  ;;  %v399_v3 = vadd.f32 3.0, %v832_v20  ;;  %v321_v44 = vmul.f32 %v319_v21, %v792_v57  ;;  %v322_v36 = vmul.f32 %v320_v2, %v316_v6 }
  0xd0   :  { %v325_v9 = vmul.f32 %v323_v8, %v788_v13  ;;  %v326_v12 = vmul.f32 %v324_v23, %v314_v16  ;;  %v246_v1 = vadd.f32 %v245_v43, %v244_v39  ;;  %v296_v7 = vadd.f32 %v294_v60, %v290_v59 }
  0xd1   :  { %v548_v62 = vpop.eup %547  ;;  %563 = vlog2.f32 %v317_v27  ;;  %v856_v14 = vadd.f32 8.0, %v832_v20  ;;  %v858_v18 = vmul.f32 0.6931472, %v538_v30  ;;  %v861_v19 = vmul.f32 0.5, %v780_v54 }
  0xd2   :  { %v550_v15 = vpop.eup %549  ;;  %v298_v57 = vmul.f32 %v542_v25, %v295_v48  ;;  %v300_v5 = vmul.f32 %v544_v32, %v296_v7  ;;  %565 = vlog2.f32 %v318_v56  ;;  %v865_v13 = vmul.f32 %v397_v63, %v832_v20 }
  0xd3   :  { %v552_v24 = vpop.eup %551  ;;  %v867_v26 = vmul.f32 %v399_v3, %v398_v0  ;;  %v869_v28 = vmul.f32 0.6931472, %v546_v47  ;;  %v871_v29 = vmul.f32 0.6931472, %v548_v62  ;;  %v327_v11 = vadd.f32 %v325_v9, %v321_v44 }
  0xd4   :  { %v554_v27 = vpop.eup %553  ;;  %v328_v4 = vadd.f32 %v326_v12, %v322_v36  ;;  %v247_v16 = vrot.slane %v246_v1, 2  ;;  %v412_v30 = vadd.f32 4.0, %v832_v20  ;;  %567 = vrcp.f32 %v856_v14 }
  0xd5   :  { %v556_v54 = vpop.eup %555  ;;  %v349_v6 = vmul.f32 %v554_v27, %v811_v10  ;;  %v413_v51 = vadd.f32 5.0, %v832_v20  ;;  %v879_v52 = vadd.f32 6.0, %v832_v20  ;;  %v882_v53 = vadd.f32 7.0, %v832_v20 }
  0xd6   :  { %v558_v31 = vpop.eup %557  ;;  %v350_v33 = vmul.f32 %v556_v54, %v816_v34  ;;  %v886_v41 = vmul.f32 0.6931472, %v552_v24  ;;  %v402_v50 = vmul.f32 %v867_v26, %v865_v13  ;;  %569 = vlog2.f32 %v856_v14 }
  0xd7   :  { %v884_v39 = vpop.eup %559  ;;  %v351_v45 = vsub.f32 2.0, %v349_v6  ;;  %v507_v17 = vadd.f32 -0.5, %v811_v10  ;;  %v508_v21 = vadd.f32 -0.5, %v816_v34  ;;  %v894_v2 = vadd.f32 %v397_v63, %v832_v20 }
  0xd8   :  { %v562_v55 = vpop.eup %561  ;;  %v352_v56 = vsub.f32 2.0, %v350_v33  ;;  %v330_v8 = vmul.f32 %v550_v15, %v327_v11  ;;  %v896_v23 = vmul.f32 0.6931472, %v558_v31  ;;  %v898_v43 = vadd.f32 %v399_v3, %v398_v0 }
  0xd9   :  { %v353_v25 = vmul.f32 %v554_v27, %v351_v45  ;;  %v900_v59 = vadd.f32 %v247_v16, %v246_v1  ;;  %v902_v32 = vmul.f32 %v413_v51, %v412_v30  ;;  %v906_v47 = vmul.f32 %v882_v53, %v879_v52 }
  0xda   :  { %v354_v60 = vmul.f32 %v556_v54, %v352_v56  ;;  %v332_v44 = vmul.f32 %v562_v55, %v328_v4  ;;  %v377_v63 = vmul.f32 %v507_v17, %v886_v41  ;;  %571 = vrcp.f32 %v402_v50 }
  0xdb   :  { %v564_v48 = vpop.eup %563  ;;  %v355_v36 = vmul.f32 %v353_v25, %v353_v25  ;;  %573 = vlog2.f32 %v402_v50  ;;  %v909_v12 = vadd.f32 %v413_v51, %v412_v30  ;;  %v509_v0 = vadd.f32 -0.5, %v856_v14 }
  0xdc   :  { %v356_v9 = vmul.f32 %v354_v60, %v354_v60  ;;  %v566_v3 = vpop.eup %565  ;;  %v912_v62 = vadd.f32 %v330_v8, %v298_v57  ;;  %v378_v7 = vmul.f32 %v508_v21, %v896_v23  ;;  %v336_v24 = vmul.f32 0.6931472, %v564_v48 }
  0xdd   :  { %v361_v1 = vmul.f32 0.003968254, %v355_v36  ;;  %v383_v15 = vmul.f32 0.0007936508, %v355_v36  ;;  %v418_v4 = vmul.f32 %v906_v47, %v902_v32  ;;  %v334_v16 = vadd.f32 %v332_v44, %v300_v5 }
  0xde   :  { %v362_v27 = vmul.f32 0.003968254, %v356_v9  ;;  %v384_v11 = vmul.f32 0.0007936508, %v356_v9  ;;  %v568_v54 = vpop.eup %567  ;;  %v379_v30 = vsub.f32 %v377_v63, %v811_v10  ;;  %v338_v33 = vmul.f32 0.6931472, %v566_v3 }
  0xdf   :  { %v363_v6 = vsub.f32 0.008333334, %v361_v1  ;;  %v385_v31 = vsub.f32 0.0027777778, %v383_v15  ;;  %v434_v45 = vmul.f32 %v568_v54, %v856_v14  ;;  %v357_v55 = vmul.f32 0.5, %v353_v25 }
  0xe0   :  { %v364_v51 = vsub.f32 0.008333334, %v362_v27  ;;  %v386_v57 = vsub.f32 0.0027777778, %v384_v11  ;;  %v570_v50 = vpop.eup %569  ;;  %v380_v17 = vsub.f32 %v378_v7, %v816_v34  ;;  %v358_v8 = vmul.f32 0.5, %v354_v60 }
  0xe1   :  { %v365_v56 = vmul.f32 %v363_v6, %v355_v36  ;;  %v387_v21 = vmul.f32 %v385_v31, %v355_v36  ;;  %v435_v22 = vsub.f32 2.0, %v434_v45  ;;  %v381_v44 = vadd.f32 0.9189385, %v379_v30 }
  0xe2   :  { %v366_v48 = vmul.f32 %v364_v51, %v356_v9  ;;  %v388_v37 = vmul.f32 %v386_v57, %v356_v9  ;;  %575 = vlog2.f32 %v418_v4  ;;  %v920_v3 = vmul.f32 0.6931472, %v570_v50 }
  0xe3   :  { %v367_v5 = vsub.f32 0.083333336, %v365_v56  ;;  %v389_v1 = vsub.f32 0.083333336, %v387_v21  ;;  %v436_v15 = vmul.f32 %v568_v54, %v435_v22  ;;  %v359_v11 = vsub.f32 %v886_v41, %v357_v55 }
  0xe4   :  { %v368_v10 = vsub.f32 0.083333336, %v366_v48  ;;  %v390_v63 = vsub.f32 0.083333336, %v388_v37  ;;  %v922_v27 = vpop.eup %571  ;;  %v382_v34 = vadd.f32 0.9189385, %v380_v17  ;;  %v360_v51 = vsub.f32 %v896_v23, %v358_v8 }
  0xe5   :  { %v369_v6 = vmul.f32 %v367_v5, %v355_v36  ;;  %v391_v7 = vmul.f32 %v389_v1, %v353_v25  ;;  %v574_v31 = vpop.eup %573  ;;  %v437_v30 = vmul.f32 %v436_v15, %v436_v15  ;;  %v340_v56 = vadd.f32 %v338_v33, %v871_v29 }
  0xe6   :  { %v370_v57 = vmul.f32 %v368_v10, %v356_v9  ;;  %v392_v45 = vmul.f32 %v390_v63, %v354_v60  ;;  %577 = vrcp.f32 %v418_v4  ;;  %v448_v48 = vmul.f32 %v509_v0, %v920_v3 }
  0xe7   :  { %v371_v21 = vsub.f32 %v359_v11, %v369_v6  ;;  %v393_v37 = vadd.f32 %v391_v7, %v381_v44  ;;  %v440_v54 = vmul.f32 0.003968254, %v437_v30  ;;  %v339_v41 = vadd.f32 %v336_v24, %v869_v28 }
  0xe8   :  { %v372_v50 = vsub.f32 %v360_v51, %v370_v57  ;;  %v394_v22 = vadd.f32 %v392_v45, %v382_v34  ;;  %v421_v23 = vadd.f32 %v882_v53, %v879_v52  ;;  %v451_v36 = vmul.f32 0.0007936508, %v437_v30 }
  0xe9   :  { %v373_v25 = vsub.f32 %v371_v21, %v912_v62  ;;  %v441_v55 = vsub.f32 0.008333334, %v440_v54  ;;  %v511_v29 = vadd.f32 -1.0, %v701_v35  ;;  %v395_v33 = vsub.f32 %v393_v37, %v339_v41 }
  0xea   :  { %v374_v60 = vsub.f32 %v372_v50, %v334_v16  ;;  %v396_v9 = vsub.f32 %v394_v22, %v340_v56  ;;  %v404_v4 = vmul.f32 %v894_v2, %v867_v26  ;;  %v452_v17 = vsub.f32 0.0027777778, %v451_v36 }
  0xeb   :  { %v510_v0 = vadd.f32 -1.0, %v703_v40  ;;  %v442_v8 = vmul.f32 %v441_v55, %v437_v30  ;;  %v449_v28 = vsub.f32 %v448_v48, %v856_v14  ;;  %v406_v53 = vmul.f32 %v898_v43, %v865_v13 }
  0xec   :  { %v458_v62 = vsel %vm99_vm1, %v396_v9, 0.0  ;;  %v469_v24 = vmul.f32 %v511_v29, %v374_v60  ;;  %v576_v52 = vpop.eup %575  ;;  %v453_v16 = vmul.f32 %v452_v17, %v437_v30  ;;  %v249_v44 = vrot.slane %v900_v59, 1 }
  0xed   :  { %v459_v5 = vadd.f32 %v458_v62, %v395_v33  ;;  %v468_v35 = vmul.f32 %v510_v0, %v373_v25  ;;  %v420_v26 = vmul.f32 %v909_v12, %v906_v47  ;;  %v422_v40 = vmul.f32 %v421_v23, %v902_v32 }
  0xee   :  { %v470_v2 = vsel %vm99_vm1, %v469_v24, 0.0  ;;  %v443_v14 = vsub.f32 0.083333336, %v442_v8  ;;  %v454_v1 = vsub.f32 0.083333336, %v453_v16  ;;  %v120_v11 = vmul.f32 %v830_v58, %v843_v61 }
  0xef   :  { %v460_v10 = vrot.slane %v459_v5, 4  ;;  %v471_v63 = vadd.f32 %v470_v2, %v468_v35  ;;  %v411_v13 = vmul.f32 0.6931472, %v574_v31  ;;  %v428_v43 = vmul.f32 0.6931472, %v576_v52 }
  0xf0   :  { %v450_v6 = vadd.f32 0.9189385, %v449_v28  ;;  %v578_v34 = vpop.eup %577  ;;  %v438_v7 = vmul.f32 0.5, %v436_v15  ;;  %v455_v51 = vmul.f32 %v454_v1, %v436_v15  ;;  %v134_v32 = vmul.f32 %v884_v39, %v845_v38 }
  0xf1   :  { %v461_v57 = vadd.f32 %v460_v10, %v459_v5  ;;  %v472_v45 = vrot.slane %v471_v63, 4  ;;  %v976_v47 = vsub.f32 0.083333336, %v848_v46  ;;  %v407_v56 = vadd.f32 %v406_v53, %v404_v4 }
  0xf2   :  { %v423_v21 = vadd.f32 %v422_v40, %v420_v26  ;;  %v444_v37 = vmul.f32 %v443_v14, %v437_v30  ;;  %v456_v50 = vadd.f32 %v455_v51, %v450_v6  ;;  %v145_v31 = vsub.f32 %v858_v18, %v861_v19 }
  0xf3   :  { %v150_v12 = vmul.f32 %v976_v47, %v796_v42  ;;  %v462_v58 = vrot.slane %v461_v57, 2  ;;  %v473_v61 = vadd.f32 %v472_v45, %v471_v63  ;;  %v250_v15 = vadd.f32 %v249_v44, %v900_v59 }
  0xf4   :  { %v409_v22 = vmul.f32 %v922_v27, %v407_v56  ;;  %v425_v54 = vmul.f32 %v578_v34, %v423_v21  ;;  %v429_v48 = vadd.f32 %v428_v43, %v411_v13  ;;  %v439_v38 = vsub.f32 %v920_v3, %v438_v7 }
  0xf5   :  { %v463_v39 = vadd.f32 %v462_v58, %v461_v57  ;;  %v474_v46 = vrot.slane %v473_v61, 2  ;;  %v151_v42 = vsub.f32 %v145_v31, %v150_v12  ;;  %v135_v36 = vadd.f32 %v134_v32, %v120_v11 }
  0xf6   :  { %v445_v41 = vsub.f32 %v439_v38, %v444_v37  ;;  %v457_v25 = vsub.f32 %v456_v50, %v429_v48  ;;  %v251_v60 = vmul.f32 0.1, %v250_v15  ;;  %v426_v9 = vadd.f32 %v425_v54, %v409_v22 }
  0xf7   :  { %v464_v30 = vrot.slane %v463_v39, 1  ;;  %v475_v23 = vadd.f32 %v474_v46, %v473_v61  ;;  %v152_v19 = vsub.f32 %v151_v42, %v135_v36  ;;  %v98_v27 = vcvt.s32.f32 %v688_v49 }
  0xf8   :  { %v446_v59 = vsub.f32 %v445_v41, %v426_v9  ;;  %v513_v17 = vadd.f32 -10.0, %v832_v20  ;;  %v977_v0 = vlaneseq }
  0xf9   :  { %v465_v55 = vadd.f32 %v464_v30, %v463_v39  ;;  %v476_v18 = vrot.slane %v475_v23, 1  ;;  %v252_v33 = vsub.f32 %v152_v19, %v251_v60 }
  0xfa   :  { %v487_v8 = vand.u32 127, %v977_v0  ;;  %v482_v62 = vmul.f32 %v513_v17, %v446_v59 }
  0xfb   :  { %v478_v29 = vsub.f32 %v457_v25, %v465_v55  ;;  %v477_v4 = vadd.f32 %v476_v18, %v475_v23  ;;  %v253_v24 = vmul.f32 %v252_v33, %v98_v27 }
  0xfc   :  { %vm490_vm4 = vcmp.lt.s32.totalorder %v487_v8, 16 }
  0xfd   :  { %v512_v3 = vadd.f32 -12.801827, %v478_v29 }
  0xff   :  { %v480_v28 = vadd.f32 %v512_v3, %v477_v4 }
 0x101   :  { %v483_v52 = vsub.f32 %v480_v28, %v482_v62 }
 0x103   :  { %v484_v53 = vadd.f32 %v483_v52, %v253_v24 }
 0x105   :  { %v491_v16 = vsel %vm490_vm4, %v484_v53, 0.0 }
 0x106   :  { %492 = vst [vmem:[#allocation3] sm:$0x1] %v491_v16 }
 0x107   :  { %590 = shalt.err (!%p587_p4)
}
 0x108   :  { %s591_s19 = scalar_lea.hbm %s974_s2, 16 }
 0x109   :  { %p592_p5 = scmp.ne.s32.totalorder %s974_s2, %s591_s19  ;;  %p595_p6 = scmp.lt.u32.totalorder %s591_s19, %s974_s2 }
 0x10b   :  { %p597_p7 = pnand %p595_p6, %p592_p5 }
 0x10d   :  { %600 = shalt.err (!%p597_p7)
}
 0x10e   :  { %502 = dma.vmem_to_hbm [thread:$0]  %s500_s14, 16, %s974_s2, [#allocation4]  }
 0x10f   :  { %601 = dma.done.wait [#allocation4], 16  }
 0x110   :  { %602 = vsyncadd [#allocation4], 4294967280 }
 0x111   :  { %506 = vsyncpa [#allocation4], 1 }

</bundles_post_ra>
